<compile_context>
chip_gen: v7x
topology: tpu7x:2x2x1
jax: 0.10.0
libtpu: 0.0.40
codegen_flags: <defaults>
</compile_context>

<pallas_src>
import functools

import jax
import jax.numpy as jnp
import numpy as np
from jax.experimental import pallas as pl
from jax.experimental.pallas import tpu as pltpu


# ----------------------------------------------------------------------------
# Fused kernel: whole hVAE forward.  Weights bf16, activations f32.
# ----------------------------------------------------------------------------
def _hvae_kernel(*refs, use_mean, hidden):
    if use_mean:
        (x_ref, in_w, in_b, enc_w, enc_b, prior, mulv_w, mulv_b,
         out_w, out_b, zms_ref, xhat_ref) = refs
        eps_ref = None
    else:
        (x_ref, in_w, in_b, enc_w, enc_b, prior, mulv_w, mulv_b,
         out_w, out_b, eps_ref, zms_ref, xhat_ref) = refs

    def silu(y):
        # y * sigmoid(y); exp + approx reciprocal both land on the EUP slot.
        return y * pl.reciprocal(1.0 + jnp.exp(-y), approx=True)

    def sigmoid_exact(y):
        # Exact divide for the final OutputBlock (parity with the reference).
        return 1.0 / (1.0 + jnp.exp(-y))

    # InputBlock 'x_in': Linear(D->H) + SiLU
    x_in = jnp.dot(x_ref[...].astype(jnp.bfloat16), in_w[...],
                   preferred_element_type=jnp.float32) + in_b[...]
    x_in = silu(x_in)

    # EncBlock 'h_enc': Linear(H->H) + SiLU
    h = jnp.dot(x_in.astype(jnp.bfloat16), enc_w[...],
                preferred_element_type=jnp.float32) + enc_b[...]
    h = silu(h)

    # GenBlock 'z': feat = h + prior (broadcast (1,H) over batch); one fused
    # mu/logvar projection of width 2H, split at H.
    feat = h + prior[...]
    mulv = jnp.dot(feat.astype(jnp.bfloat16), mulv_w[...],
                   preferred_element_type=jnp.float32) + mulv_b[...]
    mu = mulv[:, :hidden]
    logvar = jnp.clip(mulv[:, hidden:], -10.0, 10.0)   # exp overflow guard
    std = jnp.exp(0.5 * logvar)
    z = mu if use_mean else mu + std * eps_ref[...]

    # OutputBlock 'x_hat': Linear(H->D) + sigmoid (exact)
    xh = jnp.dot(z.astype(jnp.bfloat16), out_w[...],
                 preferred_element_type=jnp.float32) + out_b[...]
    xhat_ref[...] = sigmoid_exact(xh)

    # Single lane-packed slab [ z | mu | std ]  (one writeback instead of three)
    zms_ref[...] = jnp.concatenate([z, mu, std], axis=-1)


# ----------------------------------------------------------------------------
# Parameters: unpadded, weights bf16, mu/logvar fused.
# ----------------------------------------------------------------------------
def init_params(key, in_dim, hidden):
    ks = jax.random.split(key, 6)

    def lin(k, fan_in, fan_out):
        w = jax.random.normal(k, (fan_in, fan_out), jnp.float32) / jnp.sqrt(fan_in)
        b = jnp.zeros((1, fan_out), jnp.float32)
        return w, b

    in_w, in_b = lin(ks[0], in_dim, hidden)
    enc_w, enc_b = lin(ks[1], hidden, hidden)
    mu_w, mu_b = lin(ks[2], hidden, hidden)
    lv_w, lv_b = lin(ks[3], hidden, hidden)
    out_w, out_b = lin(ks[4], hidden, in_dim)
    prior_z = 0.1 * jax.random.normal(ks[5], (hidden,), jnp.float32)

    mulv_w = jnp.concatenate([mu_w, lv_w], axis=1)   # (H, 2H)
    mulv_b = jnp.concatenate([mu_b, lv_b], axis=1)   # (1, 2H)

    return dict(
        in_w=in_w.astype(jnp.bfloat16), in_b=in_b,
        enc_w=enc_w.astype(jnp.bfloat16), enc_b=enc_b,
        mulv_w=mulv_w.astype(jnp.bfloat16), mulv_b=mulv_b,
        out_w=out_w.astype(jnp.bfloat16), out_b=out_b,
        prior_z=prior_z.reshape(1, hidden),
        hidden=hidden, in_dim=in_dim)
    # TODO(synk): for real-sized models quantize weights per-generation
    # (int8 on v5e/v6e, fp8 on v7x) and K-tile the D<->H matmuls with an
    # explicit vmem_limit_bytes (v7x has 64 MiB VMEM / 32 MiB scoped default).


# ----------------------------------------------------------------------------
# Wrapper / orchestration (hVAE.forward equivalent).
# ----------------------------------------------------------------------------
def hvae_forward(params, x, eps=None, use_mean=False, stop_at=None, batch_tile=128):
    # TODO(synk): stop_at early-exit and per-block intermediates (x_in, h_enc)
    # are orchestration-only and not exposed by the fused kernel.
    del stop_at
    B = x.shape[0]
    H, D = params["hidden"], params["in_dim"]

    x_flat = x.reshape(B, -1).astype(jnp.float32)     # no HBM pad round-trip

    weight_args = [params["in_w"], params["in_b"], params["enc_w"], params["enc_b"],
                   params["prior_z"], params["mulv_w"], params["mulv_b"],
                   params["out_w"], params["out_b"]]
    args = [x_flat] + weight_args
    if not use_mean:
        assert eps is not None, "eps is required when use_mean=False"
        args.append(eps.astype(jnp.float32))

    out_shape = (jax.ShapeDtypeStruct((B, 3 * H), jnp.float32),
                 jax.ShapeDtypeStruct((B, D), jnp.float32))

    kernel = functools.partial(_hvae_kernel, use_mean=use_mean, hidden=H)

    # Advisory cost hint so XLA can overlap the weight DMA with neighbouring ops.
    flops = 2 * B * H * (2 * D + 3 * H)
    transcendentals = B * (3 * H + D) * 2
    w_bytes = sum(int(w.size) * w.dtype.itemsize for w in weight_args)
    bytes_accessed = (x_flat.size * 4 + w_bytes + B * 3 * H * 4 + B * D * 4
                      + (0 if use_mean else B * H * 4))
    cost = pl.CostEstimate(flops=flops, transcendentals=transcendentals,
                           bytes_accessed=bytes_accessed)

    if B > batch_tile and B % batch_tile == 0:
        # Batch-tiled grid: rows shard across TensorCores ("parallel"); weights use
        # a constant block index so they stay VMEM-resident across grid steps.
        row = lambda i: (i, 0)
        whole = lambda i: (0, 0)
        in_specs = [pl.BlockSpec((batch_tile, D), row)]
        in_specs += [pl.BlockSpec(tuple(w.shape), whole) for w in weight_args]
        if not use_mean:
            in_specs.append(pl.BlockSpec((batch_tile, H), row))
        out_specs = (pl.BlockSpec((batch_tile, 3 * H), row),
                     pl.BlockSpec((batch_tile, D), row))
        call = pl.pallas_call(
            kernel, out_shape=out_shape, grid=(B // batch_tile,),
            in_specs=in_specs, out_specs=out_specs,
            compiler_params=pltpu.CompilerParams(dimension_semantics=("parallel",)),
            cost_estimate=cost)
    else:
        # Small batch: single full-array block (always (8,128)-legal), one launch.
        call = pl.pallas_call(kernel, out_shape=out_shape, cost_estimate=cost)

    zms, x_hat = call(*args)
    z, mu, std = zms[:, :H], zms[:, H:2 * H], zms[:, 2 * H:]

    computed = {
        # hVAE._init_prior: prior tiled over batch (lazy broadcast, not a kernel input)
        "z_prior": jnp.broadcast_to(params["prior_z"], (B, H)),
        "z": z,
        "x_hat": x_hat,
    }
    distributions = {"z": (mu, std), "x_hat": (x_hat,)}

    # hVAE.forward epilogue
    computed["output"] = computed["x_hat"]
    distributions["output"] = distributions.pop("x_hat")[0]
    return computed, distributions

# TODO(synk): hVAE.sample_from_prior / freeze / serialize are orchestration-only
# (no tensor hot path) and are not reproduced here.


# Pure-JAX f32 reference (same math, exact sigmoid everywhere) for validation.
def _hvae_reference(params, x, eps=None, use_mean=False):
    H = params["hidden"]
    xf = x.reshape(x.shape[0], -1).astype(jnp.float32)
    silu = lambda y: y * jax.nn.sigmoid(y)
    x_in = silu(xf @ params["in_w"].astype(jnp.float32) + params["in_b"])
    h = silu(x_in @ params["enc_w"].astype(jnp.float32) + params["enc_b"])
    feat = h + params["prior_z"]
    mulv = feat @ params["mulv_w"].astype(jnp.float32) + params["mulv_b"]
    mu, logvar = mulv[:, :H], jnp.clip(mulv[:, H:], -10.0, 10.0)
    std = jnp.exp(0.5 * logvar)
    z = mu if use_mean else mu + std * eps
    x_hat = jax.nn.sigmoid(z @ params["out_w"].astype(jnp.float32) + params["out_b"])
    return z, mu, std, x_hat


if __name__ == "__main__":
    B, C, Himg, Wimg = 2, 4, 16, 16
    hidden = 32
    in_dim = C * Himg * Wimg

    key = jax.random.PRNGKey(0)
    k_x, k_eps, k_p, k_xl, k_el = jax.random.split(key, 5)

    x = jax.random.normal(k_x, (B, C, Himg, Wimg), jnp.float32)
    eps = jax.random.normal(k_eps, (B, hidden), jnp.float32)
    params = init_params(k_p, in_dim, hidden)

    # Inference path (posterior mean), small batch -> gridless single launch.
    computed, distributions = hvae_forward(params, x, use_mean=True)
    out = jax.block_until_ready(computed["output"])
    assert out.shape == (B, in_dim)
    assert distributions["output"].shape == (B, in_dim)
    assert distributions["z"][0].shape == (B, hidden)
    assert distributions["z"][1].shape == (B, hidden)

    # Sampling path (reparameterisation with explicit eps).
    computed_s, distributions_s = hvae_forward(params, x, eps=eps, use_mean=False)
    jax.block_until_ready(computed_s["output"])
    assert computed_s["z"].shape == (B, hidden)
    assert computed_s["output"].shape == (B, in_dim)

    # Numerical parity vs. f32 reference (bf16 matmul operands + approx
    # reciprocal in the hidden SiLUs -> loose tolerance).
    z_r, mu_r, std_r, xh_r = _hvae_reference(params, x, eps=eps, use_mean=False)
    np.testing.assert_allclose(np.asarray(computed_s["output"]), np.asarray(xh_r),
                               atol=5e-2, rtol=5e-2)
    np.testing.assert_allclose(np.asarray(distributions_s["z"][0]), np.asarray(mu_r),
                               atol=5e-2, rtol=5e-2)
    np.testing.assert_allclose(np.asarray(distributions_s["z"][1]), np.asarray(std_r),
                               atol=5e-2, rtol=5e-2)

    # Larger batch exercising the batch-tiled "parallel" grid path.
    Bl = 256
    xl = jax.random.normal(k_xl, (Bl, C, Himg, Wimg), jnp.float32)
    epsl = jax.random.normal(k_el, (Bl, hidden), jnp.float32)
    computed_l, _ = hvae_forward(params, xl, eps=epsl, use_mean=False, batch_tile=128)
    outl = jax.block_until_ready(computed_l["output"])
    assert outl.shape == (Bl, in_dim)
    zl_r, _, _, xhl_r = _hvae_reference(params, xl, eps=epsl, use_mean=False)
    np.testing.assert_allclose(np.asarray(outl), np.asarray(xhl_r),
                               atol=5e-2, rtol=5e-2)

    print("KERNEL_OK")
</pallas_src>

<mosaic_0001>
module attributes {stable_mosaic.version = 11 : i64} {
  func.func @_hvae_kernel(%arg0: memref<2x1024xf32, #tpu.memory_space<vmem>>, %arg1: memref<1024x32xbf16, #tpu.memory_space<vmem>>, %arg2: memref<1x32xf32, #tpu.memory_space<vmem>>, %arg3: memref<32x32xbf16, #tpu.memory_space<vmem>>, %arg4: memref<1x32xf32, #tpu.memory_space<vmem>>, %arg5: memref<1x32xf32, #tpu.memory_space<vmem>>, %arg6: memref<32x64xbf16, #tpu.memory_space<vmem>>, %arg7: memref<1x64xf32, #tpu.memory_space<vmem>>, %arg8: memref<32x1024xbf16, #tpu.memory_space<vmem>>, %arg9: memref<1x1024xf32, #tpu.memory_space<vmem>>, %arg10: memref<2x96xf32, #tpu.memory_space<vmem>>, %arg11: memref<2x1024xf32, #tpu.memory_space<vmem>>) attributes {dimension_semantics = [], scalar_prefetch = 0 : i64, scratch_operands = 0 : i64, tpu.core_type = #tpu.core_type<tc>} {
    %c0 = arith.constant 0 : index
    %c0_0 = arith.constant 0 : index
    %0 = vector.load %arg0[%c0, %c0_0] : memref<2x1024xf32, #tpu.memory_space<vmem>>, vector<2x1024xf32>
    %1 = arith.truncf %0 : vector<2x1024xf32> to vector<2x1024xbf16>
    %c0_1 = arith.constant 0 : index
    %c0_2 = arith.constant 0 : index
    %2 = vector.load %arg1[%c0_1, %c0_2] : memref<1024x32xbf16, #tpu.memory_space<vmem>>, vector<1024x32xbf16>
    %cst = arith.constant dense<0.000000e+00> : vector<2x32xf32>
    %3 = tpu.matmul %1, %2, %cst {dimension_numbers = #tpu.dot_dimension_numbers<[1], [0], [0], [1], [0, 0, 1, 1], [], []>} : vector<2x1024xbf16>, vector<1024x32xbf16>, vector<2x32xf32> -> vector<2x32xf32>
    %c0_3 = arith.constant 0 : index
    %c0_4 = arith.constant 0 : index
    %4 = vector.load %arg2[%c0_3, %c0_4] : memref<1x32xf32, #tpu.memory_space<vmem>>, vector<1x32xf32>
    %5 = vector.broadcast %4 : vector<1x32xf32> to vector<2x32xf32>
    %6 = arith.addf %3, %5 : vector<2x32xf32>
    %cst_5 = arith.constant 0.000000e+00 : f32
    %7 = vector.broadcast %cst_5 : f32 to vector<2x32xf32>
    %8 = arith.subf %7, %6 : vector<2x32xf32>
    %9 = math.exp %8 : vector<2x32xf32>
    %cst_6 = arith.constant 1.000000e+00 : f32
    %10 = vector.broadcast %cst_6 : f32 to vector<2x32xf32>
    %11 = arith.addf %10, %9 : vector<2x32xf32>
    %12 = tpu.reciprocal %11 {approx = true} : vector<2x32xf32> -> vector<2x32xf32>
    %13 = arith.mulf %6, %12 : vector<2x32xf32>
    %14 = arith.truncf %13 : vector<2x32xf32> to vector<2x32xbf16>
    %c0_7 = arith.constant 0 : index
    %c0_8 = arith.constant 0 : index
    %15 = vector.load %arg3[%c0_7, %c0_8] : memref<32x32xbf16, #tpu.memory_space<vmem>>, vector<32x32xbf16>
    %cst_9 = arith.constant dense<0.000000e+00> : vector<2x32xf32>
    %16 = tpu.matmul %14, %15, %cst_9 {dimension_numbers = #tpu.dot_dimension_numbers<[1], [0], [0], [1], [0, 0, 1, 1], [], []>} : vector<2x32xbf16>, vector<32x32xbf16>, vector<2x32xf32> -> vector<2x32xf32>
    %c0_10 = arith.constant 0 : index
    %c0_11 = arith.constant 0 : index
    %17 = vector.load %arg4[%c0_10, %c0_11] : memref<1x32xf32, #tpu.memory_space<vmem>>, vector<1x32xf32>
    %18 = vector.broadcast %17 : vector<1x32xf32> to vector<2x32xf32>
    %19 = arith.addf %16, %18 : vector<2x32xf32>
    %cst_12 = arith.constant 0.000000e+00 : f32
    %20 = vector.broadcast %cst_12 : f32 to vector<2x32xf32>
    %21 = arith.subf %20, %19 : vector<2x32xf32>
    %22 = math.exp %21 : vector<2x32xf32>
    %cst_13 = arith.constant 1.000000e+00 : f32
    %23 = vector.broadcast %cst_13 : f32 to vector<2x32xf32>
    %24 = arith.addf %23, %22 : vector<2x32xf32>
    %25 = tpu.reciprocal %24 {approx = true} : vector<2x32xf32> -> vector<2x32xf32>
    %26 = arith.mulf %19, %25 : vector<2x32xf32>
    %c0_14 = arith.constant 0 : index
    %c0_15 = arith.constant 0 : index
    %27 = vector.load %arg5[%c0_14, %c0_15] : memref<1x32xf32, #tpu.memory_space<vmem>>, vector<1x32xf32>
    %28 = vector.broadcast %27 : vector<1x32xf32> to vector<2x32xf32>
    %29 = arith.addf %26, %28 : vector<2x32xf32>
    %30 = arith.truncf %29 : vector<2x32xf32> to vector<2x32xbf16>
    %c0_16 = arith.constant 0 : index
    %c0_17 = arith.constant 0 : index
    %31 = vector.load %arg6[%c0_16, %c0_17] : memref<32x64xbf16, #tpu.memory_space<vmem>>, vector<32x64xbf16>
    %cst_18 = arith.constant dense<0.000000e+00> : vector<2x64xf32>
    %32 = tpu.matmul %30, %31, %cst_18 {dimension_numbers = #tpu.dot_dimension_numbers<[1], [0], [0], [1], [0, 0, 1, 1], [], []>} : vector<2x32xbf16>, vector<32x64xbf16>, vector<2x64xf32> -> vector<2x64xf32>
    %c0_19 = arith.constant 0 : index
    %c0_20 = arith.constant 0 : index
    %33 = vector.load %arg7[%c0_19, %c0_20] : memref<1x64xf32, #tpu.memory_space<vmem>>, vector<1x64xf32>
    %34 = vector.broadcast %33 : vector<1x64xf32> to vector<2x64xf32>
    %35 = arith.addf %32, %34 : vector<2x64xf32>
    %36 = vector.extract_strided_slice %35 {offsets = [0, 0], sizes = [2, 32], strides = [1, 1]} : vector<2x64xf32> to vector<2x32xf32>
    %37 = vector.extract_strided_slice %35 {offsets = [0, 32], sizes = [2, 32], strides = [1, 1]} : vector<2x64xf32> to vector<2x32xf32>
    %cst_21 = arith.constant -1.000000e+01 : f32
    %cst_22 = arith.constant 1.000000e+01 : f32
    %38 = vector.broadcast %cst_21 : f32 to vector<2x32xf32>
    %39 = arith.maximumf %38, %37 : vector<2x32xf32>
    %40 = vector.broadcast %cst_22 : f32 to vector<2x32xf32>
    %41 = arith.minimumf %40, %39 : vector<2x32xf32>
    %cst_23 = arith.constant 5.000000e-01 : f32
    %42 = vector.broadcast %cst_23 : f32 to vector<2x32xf32>
    %43 = arith.mulf %42, %41 : vector<2x32xf32>
    %44 = math.exp %43 : vector<2x32xf32>
    %45 = arith.truncf %36 : vector<2x32xf32> to vector<2x32xbf16>
    %c0_24 = arith.constant 0 : index
    %c0_25 = arith.constant 0 : index
    %46 = vector.load %arg8[%c0_24, %c0_25] : memref<32x1024xbf16, #tpu.memory_space<vmem>>, vector<32x1024xbf16>
    %cst_26 = arith.constant dense<0.000000e+00> : vector<2x1024xf32>
    %47 = tpu.matmul %45, %46, %cst_26 {dimension_numbers = #tpu.dot_dimension_numbers<[1], [0], [0], [1], [0, 0, 1, 1], [], []>} : vector<2x32xbf16>, vector<32x1024xbf16>, vector<2x1024xf32> -> vector<2x1024xf32>
    %c0_27 = arith.constant 0 : index
    %c0_28 = arith.constant 0 : index
    %48 = vector.load %arg9[%c0_27, %c0_28] : memref<1x1024xf32, #tpu.memory_space<vmem>>, vector<1x1024xf32>
    %49 = vector.broadcast %48 : vector<1x1024xf32> to vector<2x1024xf32>
    %50 = arith.addf %47, %49 : vector<2x1024xf32>
    %cst_29 = arith.constant 0.000000e+00 : f32
    %51 = vector.broadcast %cst_29 : f32 to vector<2x1024xf32>
    %52 = arith.subf %51, %50 : vector<2x1024xf32>
    %53 = math.exp %52 : vector<2x1024xf32>
    %cst_30 = arith.constant 1.000000e+00 : f32
    %54 = vector.broadcast %cst_30 : f32 to vector<2x1024xf32>
    %55 = arith.addf %54, %53 : vector<2x1024xf32>
    %cst_31 = arith.constant 1.000000e+00 : f32
    %56 = vector.broadcast %cst_31 : f32 to vector<2x1024xf32>
    %57 = arith.divf %56, %55 : vector<2x1024xf32>
    %c0_32 = arith.constant 0 : index
    %c0_33 = arith.constant 0 : index
    %58 = vector.load %arg11[%c0_32, %c0_33] : memref<2x1024xf32, #tpu.memory_space<vmem>>, vector<2x1024xf32>
    tpu.vector_store %arg11[%c0_32, %c0_33], %57 {strides = array<i32>} : memref<2x1024xf32, #tpu.memory_space<vmem>>, vector<2x1024xf32>,
    %59 = tpu.concatenate %36, %36, %44 in 1 : vector<2x32xf32>, vector<2x32xf32>, vector<2x32xf32> -> vector<2x96xf32>
    %c0_34 = arith.constant 0 : index
    %c0_35 = arith.constant 0 : index
    %60 = vector.load %arg10[%c0_34, %c0_35] : memref<2x96xf32, #tpu.memory_space<vmem>>, vector<2x96xf32>
    tpu.vector_store %arg10[%c0_34, %c0_35], %59 {strides = array<i32>} : memref<2x96xf32, #tpu.memory_space<vmem>>, vector<2x96xf32>,
    return
  }
}

</mosaic_0001>

<bundles_post_ra>
// kernel: tpu_custom_call.1
= control target key start
LH: loop header
LB: loop body
LE: loop exit
PB: predicated region body
PF: predicated region fallthrough
CT: control target
= control target key end

     0   :  { %17 = vsyncpa [#allocation3], 0  ;;  %v48_v28 = vlaneseq  ;;  %v1746_v36 = vmov 1983009808   ;;  %s2138_s0 = inlined_call_operand.vmem [shape: f32[2,1024], index: 0, kind: input, shape index: {}]   ;;  %s2139_s1 = inlined_call_operand.vmem [shape: bf16[1024,32], index: 1, kind: input, shape index: {}]   ;;  %s2140_s2 = inlined_call_operand.vmem [shape: f32[1,32], index: 2, kind: input, shape index: {}]   ;;  %s2141_s3 = inlined_call_operand.vmem [shape: bf16[32,32], index: 3, kind: input, shape index: {}]   ;;  %s2142_s4 = inlined_call_operand.vmem [shape: f32[1,32], index: 4, kind: input, shape index: {}]   ;;  %s2143_s5 = inlined_call_operand.vmem [shape: f32[1,32], index: 5, kind: input, shape index: {}]   ;;  %s2144_s6 = inlined_call_operand.vmem [shape: bf16[32,64], index: 6, kind: input, shape index: {}]   ;;  %s2145_s7 = inlined_call_operand.vmem [shape: f32[1,64], index: 7, kind: input, shape index: {}]   ;;  %s2146_s8 = inlined_call_operand.vmem [shape: bf16[32,1024], index: 8, kind: input, shape index: {}]   ;;  %s2147_s9 = inlined_call_operand.vmem [shape: f32[1,1024], index: 9, kind: input, shape index: {}]   ;;  %s2148_s10 = inlined_call_operand.hbm [shape: f32[2,96], index: 10, kind: output, shape index: {0}]   ;;  %s2149_s11 = inlined_call_operand.hbm [shape: f32[2,1024], index: 11, kind: output, shape index: {1}]  }
   0x1   :  { %v1586_v0 = vld [vmem:[%s2139_s1 + $0x40] sm:$0xff]   ;;  %v1590_v4 = vld [vmem:[%s2139_s1 + $0x48] sm:$0xff]   ;;  %v1594_v8 = vld [vmem:[%s2139_s1 + $0x50] sm:$0xff]   ;;  %v46_v37 = vunpack.c.l.s4 %v1746_v36 }
   0x2   :  { %v1587_v1 = vld [vmem:[%s2139_s1 + $0xc0] sm:$0xff]   ;;  %1469 = vmatprep.subr.bf16.mxu0 %v1586_v0  ;;  %v1591_v5 = vld [vmem:[%s2139_s1 + $0xc8] sm:$0xff]   ;;  %v1595_v9 = vld [vmem:[%s2139_s1 + $0xd0] sm:$0xff]   ;;  %v1909_v33 = vshrl.u32 %v48_v28, 7 }
   0x3   :  { %v1588_v2 = vld [vmem:[%s2139_s1] sm:$0xff]   ;;  %1491 = vmatprep.subr.bf16.mxu1 %v1587_v1  ;;  %v1592_v6 = vld [vmem:[%s2139_s1 + $0x8] sm:$0xff]   ;;  %v1596_v10 = vld [vmem:[%s2139_s1 + $0x10] sm:$0xff]   ;;  %v47_v39 = vunpack.c.0.s8 %v46_v37 }
   0x4   :  { %v1589_v3 = vld [vmem:[%s2139_s1 + $0x80] sm:$0xff]   ;;  %1470 = vmatpush3.bf16.msra.mxu0 %v1588_v2  ;;  %v1593_v7 = vld [vmem:[%s2139_s1 + $0x88] sm:$0xff]   ;;  %v1597_v11 = vld [vmem:[%s2139_s1 + $0x90] sm:$0xff]  }
   0x5   :  { %1492 = vmatpush3.bf16.msra.mxu1 %v1589_v3  ;;  %1471 = vmatprep.subr.bf16.mxu0 %v1590_v4  ;;  %v1598_v12 = vld [vmem:[%s2139_s1 + $0x58] sm:$0xff]   ;;  %v1602_v16 = vld [vmem:[%s2139_s1 + $0x60] sm:$0xff]   ;;  %v1606_v20 = vld [vmem:[%s2139_s1 + $0x68] sm:$0xff]   ;;  %v1921_v41 = vsub.s32 %v47_v39, %v1909_v33 }
   0x6   :  { %1493 = vmatprep.subr.bf16.mxu1 %v1591_v5  ;;  %v1599_v13 = vld [vmem:[%s2139_s1 + $0xd8] sm:$0xff]   ;;  %v1603_v17 = vld [vmem:[%s2139_s1 + $0xe0] sm:$0xff]   ;;  %v1607_v21 = vld [vmem:[%s2139_s1 + $0xe8] sm:$0xff]  }
   0x7   :  { %v1600_v14 = vld [vmem:[%s2139_s1 + $0x18] sm:$0xff]   ;;  %v1604_v18 = vld [vmem:[%s2139_s1 + $0x20] sm:$0xff]   ;;  %v1608_v22 = vld [vmem:[%s2139_s1 + $0x28] sm:$0xff]  }
   0x8   :  { %1472 = vmatpush3.bf16.msra.mxu0 %v1592_v6  ;;  %v1601_v15 = vld [vmem:[%s2139_s1 + $0x98] sm:$0xff]   ;;  %v1605_v19 = vld [vmem:[%s2139_s1 + $0xa0] sm:$0xff]   ;;  %v1609_v23 = vld [vmem:[%s2139_s1 + $0xa8] sm:$0xff]  }
   0x9   :  { %1494 = vmatpush3.bf16.msra.mxu1 %v1593_v7  ;;  %1473 = vmatprep.subr.bf16.mxu0 %v1594_v8  ;;  %v1610_v24 = vld [vmem:[%s2139_s1 + $0x70] sm:$0xff]   ;;  %v1614_v29 = vld [vmem:[%s2139_s1 + $0x78] sm:$0xff]   ;;  %v40_v34 = vld [vmem:[%s2138_s0] sm:$0xff] }
   0xa   :  { %1495 = vmatprep.subr.bf16.mxu1 %v1595_v9  ;;  %v1611_v25 = vld [vmem:[%s2139_s1 + $0xf0] sm:$0xff]   ;;  %v1615_v30 = vld [vmem:[%s2139_s1 + $0xf8] sm:$0xff]   ;;  %v1619_v35 = vld [vmem:[%s2139_s1 + $0x140] sm:$0xff]   ;;  %v44_v40 = vcombine.high %v40_v34, %v40_v34  ;;  %v51_v42 = vrot.slane %v40_v34, %v1921_v41 }
   0xb   :  { %v1612_v26 = vld [vmem:[%s2139_s1 + $0x30] sm:$0xff]   ;;  %v1616_v31 = vld [vmem:[%s2139_s1 + $0x38] sm:$0xff]   ;;  %v1620_v38 = vld [vmem:[%s2139_s1 + $0x1c0] sm:$0xff]  }
   0xc   :  { %1474 = vmatpush3.bf16.msra.mxu0 %v1596_v10  ;;  %v1613_v27 = vld [vmem:[%s2139_s1 + $0xb0] sm:$0xff]   ;;  %v1617_v32 = vld [vmem:[%s2139_s1 + $0xb8] sm:$0xff]   ;;  %v58_v43 = vrot.slane %v44_v40, %v1921_v41  ;;  %v59_v44 = vcombine.high %v51_v42, %v51_v42  ;;  %v1621_v46 = vld [vmem:[%s2139_s1 + $0x100] sm:$0xff]   ;;  %v86_v47 = vpack.c.bf16 %v51_v42, %v51_v42 }
   0xd   :  { %1496 = vmatpush3.bf16.msra.mxu1 %v1597_v11  ;;  %1475 = vmatprep.subr.bf16.mxu0 %v1598_v12  ;;  %v1622_v49 = vld [vmem:[%s2139_s1 + $0x180] sm:$0xff]   ;;  %v1623_v52 = vld [vmem:[%s2139_s1 + $0x148] sm:$0xff]   ;;  %v1627_v56 = vld [vmem:[%s2139_s1 + $0x150] sm:$0xff]  }
   0xe   :  { %1497 = vmatprep.subr.bf16.mxu1 %v1599_v13  ;;  %v60_v45 = vcombine.high %v58_v43, %v58_v43  ;;  %v88_v48 = vpack.c.bf16 %v58_v43, %v58_v43  ;;  %v87_v50 = vpack.c.bf16 %v59_v44, %v59_v44  ;;  %v1624_v53 = vld [vmem:[%s2139_s1 + $0x1c8] sm:$0xff]   ;;  %v1628_v57 = vld [vmem:[%s2139_s1 + $0x1d0] sm:$0xff]   ;;  %v1631_v60 = vld [vmem:[%s2139_s1 + $0x158] sm:$0xff]  }
   0xf   :  { %v1625_v54 = vld [vmem:[%s2139_s1 + $0x108] sm:$0xff]   ;;  %v1629_v58 = vld [vmem:[%s2139_s1 + $0x110] sm:$0xff]   ;;  %v1632_v61 = vld [vmem:[%s2139_s1 + $0x1d8] sm:$0xff]  }
  0x10   :  { %1476 = vmatpush3.bf16.msra.mxu0 %v1600_v14  ;;  %v89_v51 = vpack.c.bf16 %v60_v45, %v60_v45  ;;  %645 = vmatprep.mubr.bf16.mxu0 %v87_v50  ;;  %v1626_v55 = vld [vmem:[%s2139_s1 + $0x188] sm:$0xff]   ;;  %v1630_v59 = vld [vmem:[%s2139_s1 + $0x190] sm:$0xff]   ;;  %v1633_v62 = vld [vmem:[%s2139_s1 + $0x118] sm:$0xff]  }
  0x11   :  { %1498 = vmatpush3.bf16.msra.mxu1 %v1601_v15  ;;  %1477 = vmatprep.subr.bf16.mxu0 %v1602_v16  ;;  %v1634_v63 = vld [vmem:[%s2139_s1 + $0x198] sm:$0xff]   ;;  %v1635_v0 = vld [vmem:[%s2139_s1 + $0x160] sm:$0xff]   ;;  %v1639_v4 = vld [vmem:[%s2139_s1 + $0x168] sm:$0xff]  }
  0x12   :  { %1499 = vmatprep.subr.bf16.mxu1 %v1603_v17  ;;  %685 = vmatprep.mubr.bf16.mxu1 %v89_v51  ;;  %v1636_v1 = vld [vmem:[%s2139_s1 + $0x1e0] sm:$0xff]   ;;  %v1640_v5 = vld [vmem:[%s2139_s1 + $0x1e8] sm:$0xff]   ;;  %v1643_v8 = vld [vmem:[%s2139_s1 + $0x170] sm:$0xff]  }
  0x13   :  { %v1637_v2 = vld [vmem:[%s2139_s1 + $0x120] sm:$0xff]   ;;  %v1641_v6 = vld [vmem:[%s2139_s1 + $0x128] sm:$0xff]   ;;  %v1644_v9 = vld [vmem:[%s2139_s1 + $0x1f0] sm:$0xff]  }
  0x14   :  { %1478 = vmatpush3.bf16.msra.mxu0 %v1604_v18  ;;  %v1638_v3 = vld [vmem:[%s2139_s1 + $0x1a0] sm:$0xff]   ;;  %v1642_v7 = vld [vmem:[%s2139_s1 + $0x1a8] sm:$0xff]   ;;  %v1645_v11 = vld [vmem:[%s2139_s1 + $0x130] sm:$0xff]  }
  0x15   :  { %1500 = vmatpush3.bf16.msra.mxu1 %v1605_v19  ;;  %1479 = vmatprep.subr.bf16.mxu0 %v1606_v20  ;;  %v41_v10 = vld [vmem:[%s2138_s0 + $0x8] sm:$0xff]  ;;  %v1646_v14 = vld [vmem:[%s2139_s1 + $0x1b0] sm:$0xff]  }
  0x16   :  { %1501 = vmatprep.subr.bf16.mxu1 %v1607_v21  ;;  %v68_v12 = vrot.slane %v41_v10, %v1921_v41  ;;  %v61_v13 = vcombine.high %v41_v10, %v41_v10 }
  0x18   :  { %1480 = vmatpush3.bf16.msra.mxu0 %v1608_v22  ;;  %v76_v15 = vcombine.high %v68_v12, %v68_v12  ;;  %v75_v16 = vrot.slane %v61_v13, %v1921_v41 }
  0x19   :  { %1502 = vmatpush3.bf16.msra.mxu1 %v1609_v23  ;;  %1481 = vmatprep.subr.bf16.mxu0 %v1610_v24 }
  0x1a   :  { %1503 = vmatprep.subr.bf16.mxu1 %v1611_v25 }
  0x1c   :  { %1482 = vmatpush3.bf16.msra.mxu0 %v1612_v26 }
  0x1d   :  { %1504 = vmatpush3.bf16.msra.mxu1 %v1613_v27  ;;  %1483 = vmatprep.subr.bf16.mxu0 %v1614_v29 }
  0x1e   :  { %1505 = vmatprep.subr.bf16.mxu1 %v1615_v30 }
  0x20   :  { %1484 = vmatpush3.bf16.msra.mxu0 %v1616_v31 }
  0x21   :  { %1506 = vmatpush3.bf16.msra.mxu1 %v1617_v32  ;;  %1513 = vmatprep.subr.bf16.mxu0 %v1619_v35 }
  0x22   :  { %1535 = vmatprep.subr.bf16.mxu1 %v1620_v38 }
  0x23   :  { %646 = vmatmul.mubr.bf16.vlgmr.msra.gmra.mrb[0].mxu0 %v86_v47 }
  0x24   :  { %686 = vmatmul.mubr.bf16.vlgmr.msra.gmra.mrb[0].mxu1 %v88_v48  ;;  %1514 = vmatpush3.bf16.msra.mxu0 %v1621_v46 }
  0x25   :  { %1536 = vmatpush3.bf16.msra.mxu1 %v1622_v49  ;;  %1515 = vmatprep.subr.bf16.mxu0 %v1623_v52 }
  0x26   :  { %1537 = vmatprep.subr.bf16.mxu1 %v1624_v53 }
  0x28   :  { %1516 = vmatpush3.bf16.msra.mxu0 %v1625_v54 }
  0x29   :  { %1538 = vmatpush3.bf16.msra.mxu1 %v1626_v55  ;;  %1517 = vmatprep.subr.bf16.mxu0 %v1627_v56 }
  0x2a   :  { %1539 = vmatprep.subr.bf16.mxu1 %v1628_v57 }
  0x2c   :  { %1518 = vmatpush3.bf16.msra.mxu0 %v1629_v58 }
  0x2d   :  { %1540 = vmatpush3.bf16.msra.mxu1 %v1630_v59  ;;  %1519 = vmatprep.subr.bf16.mxu0 %v1631_v60 }
  0x2e   :  { %1541 = vmatprep.subr.bf16.mxu1 %v1632_v61 }
  0x30   :  { %1520 = vmatpush3.bf16.msra.mxu0 %v1633_v62 }
  0x31   :  { %1542 = vmatpush3.bf16.msra.mxu1 %v1634_v63  ;;  %1521 = vmatprep.subr.bf16.mxu0 %v1635_v0 }
  0x32   :  { %1543 = vmatprep.subr.bf16.mxu1 %v1636_v1 }
  0x34   :  { %1522 = vmatpush3.bf16.msra.mxu0 %v1637_v2 }
  0x35   :  { %1544 = vmatpush3.bf16.msra.mxu1 %v1638_v3  ;;  %1523 = vmatprep.subr.bf16.mxu0 %v1639_v4 }
  0x36   :  { %1545 = vmatprep.subr.bf16.mxu1 %v1640_v5 }
  0x38   :  { %1524 = vmatpush3.bf16.msra.mxu0 %v1641_v6 }
  0x39   :  { %1546 = vmatpush3.bf16.msra.mxu1 %v1642_v7 }
  0x3a   :  { %18 = vsyncpa [#allocation5], 0  ;;  %1525 = vmatprep.subr.bf16.mxu0 %v1643_v8  ;;  %1547 = vmatprep.subr.bf16.mxu1 %v1644_v9  ;;  %v1647_v17 = vld [vmem:[%s2139_s1 + $0x178] sm:$0xff]   ;;  %v91_v19 = vpack.c.bf16 %v76_v15, %v76_v15  ;;  %v77_v20 = vcombine.high %v75_v16, %v75_v16  ;;  %v90_v24 = vpack.c.bf16 %v68_v12, %v68_v12  ;;  %v1652_v26 = vld [vmem:[%s2141_s3] sm:$0xff]   ;;  %v1747_v27 = vmov 0.0  }
  0x3b   :  { %v1648_v18 = vld [vmem:[%s2139_s1 + $0x1f8] sm:$0xff]   ;;  %v92_v25 = vpack.c.bf16 %v75_v16, %v75_v16  ;;  %v1653_v28 = vld [vmem:[%s2141_s3 + $0x8] sm:$0xff]   ;;  %vm1748_vm0 = vmmov 0   ;;  %v1374_v31 = vld [vmem:[%s2140_s2] ss:$0 sm:$0xff]  ;;  %vm803_vm1 = vcmask 261120  }
  0x3c   :  { %1526 = vmatpush3.bf16.msra.mxu0 %v1645_v11  ;;  %v1649_v21 = vld [vmem:[%s2139_s1 + $0x138] sm:$0xff]   ;;  %v93_v23 = vpack.c.bf16 %v77_v20, %v77_v20  ;;  %725 = vmatprep.mubr.bf16.mxu0 %v91_v19  ;;  %v1654_v63 = vld [vmem:[%s2144_s6] sm:$0xff]   ;;  %v1655_v0 = vld [vmem:[%s2144_s6 + $0x8] sm:$0xff]   ;;  %vm1342_vm2 = vcmask 523264   ;;  %vm1344_vm3 = vcmask 779264  }
  0x3d   :  { %1548 = vmatpush3.bf16.msra.mxu1 %v1646_v14  ;;  %v1650_v22 = vld [vmem:[%s2139_s1 + $0x1b8] sm:$0xff]   ;;  %1527 = vmatprep.subr.bf16.mxu0 %v1647_v17  ;;  %v934_v1 = vld [vmem:[%s2146_s8] sm:$0xff]  ;;  %v935_v3 = vld [vmem:[%s2146_s8 + $0x8] sm:$0xff] }
  0x3e   :  { %1549 = vmatprep.subr.bf16.mxu1 %v1648_v18  ;;  %765 = vmatprep.mubr.bf16.mxu1 %v93_v23  ;;  %v938_v2 = vld [vmem:[%s2146_s8 + $0x20] sm:$0xff]  ;;  %v939_v6 = vld [vmem:[%s2146_s8 + $0x28] sm:$0xff] }
  0x3f   :  { %v1449_v4 = vcombine.low %v934_v1, %v938_v2  ;;  %v1450_v5 = vcombine.high %v934_v1, %v938_v2  ;;  %v1451_v7 = vcombine.low %v935_v3, %v939_v6  ;;  %v1452_v8 = vcombine.high %v935_v3, %v939_v6  ;;  %v1439_v9 = vld [vmem:[%s2142_s4] ss:$0 sm:$0xff] }
  0x40   :  { %1528 = vmatpush3.bf16.msra.mxu0 %v1649_v21  ;;  %v1443_v20 = vld [vmem:[%s2143_s5] ss:$0 sm:$0xff] }
  0x41   :  { %1550 = vmatpush3.bf16.msra.mxu1 %v1650_v22  ;;  %1563 = vmatprep.subr.bf16.mxu0 %v1747_v27 }
  0x42   :  { %1571 = vmatprep.subr.bf16.mxu1 %v1747_v27 }
  0x43   :  { %726 = vmatmul.mubr.bf16.vlgmr.msra.gmra.mrb[4].mxu0 %v90_v24  ;;  %v942_v24 = vld [vmem:[%s2146_s8 + $0x40] sm:$0xff] }
  0x44   :  { %766 = vmatmul.mubr.bf16.vlgmr.msra.gmra.mrb[4].mxu1 %v92_v25  ;;  %1564 = vmatpush3.bf16.msra.mxu0 %v1652_v26  ;;  %v946_v25 = vld [vmem:[%s2146_s8 + $0x60] sm:$0xff]  ;;  %v943_v26 = vld [vmem:[%s2146_s8 + $0x48] sm:$0xff] }
  0x45   :  { %1565 = vmatprep.subr.bf16.mxu0 %v1747_v27  ;;  %1567 = vmatprep.mubr.msk.bf16.mxu0 %vm1748_vm0, %v1747_v27 }
  0x46   :  { %1575 = vmatprep.mubr.msk.bf16.mxu1 %vm1748_vm0, %v1747_v27  ;;  %1572 = vmatpush3.bf16.msra.mxu1 %v1654_v63 }
  0x47   :  { %1573 = vmatprep.subr.bf16.mxu1 %v1747_v27  ;;  %v1458_v27 = vcombine.high %v942_v24, %v946_v25 }
  0x48   :  { %1566 = vmatpush3.bf16.msra.mxu0 %v1653_v28  ;;  %v947_v28 = vld [vmem:[%s2146_s8 + $0x68] sm:$0xff] }
  0x49   :  { %1075 = vmatprep.subr.bf16.mxu0 %v1450_v5 }
  0x4a   :  { %1574 = vmatpush3.bf16.msra.mxu1 %v1655_v0 }
  0x4b   :  { %1116 = vmatprep.subr.bf16.mxu1 %v1452_v8 }
  0xf6   :  { %v1485_v29 = vpop.f32.mrb[0].mxu0 }
  0xf7   :  { %v1507_v30 = vpop.f32.mrb[0].mxu1  ;;  %v1486_v32 = vpop.f32.mrb[1].mxu0 }
  0xf8   :  { %v1508_v34 = vpop.f32.mrb[1].mxu1  ;;  %v1487_v35 = vadd.f32 %v1486_v32, %v1485_v29  ;;  %v1488_v37 = vpop.f32.mrb[2].mxu0  ;;  %v1457_v29 = vcombine.low %v942_v24, %v946_v25  ;;  %v936_v32 = vld [vmem:[%s2146_s8 + $0x10] sm:$0xff] }
  0xf9   :  { %v1509_v36 = vadd.f32 %v1508_v34, %v1507_v30  ;;  %v1510_v38 = vpop.f32.mrb[2].mxu1  ;;  %v1489_v39 = vpop.f32.mrb[3].mxu0  ;;  %v1459_v30 = vcombine.low %v943_v26, %v947_v28  ;;  %v940_v34 = vld [vmem:[%s2146_s8 + $0x30] sm:$0xff]  ;;  %v941_v37 = vld [vmem:[%s2146_s8 + $0x38] sm:$0xff] }
  0xfa   :  { %v1511_v40 = vpop.f32.mrb[3].mxu1  ;;  %v648_v42 = vadd.f32 %v1487_v35, %v1374_v31  ;;  %v1460_v31 = vcombine.high %v943_v26, %v947_v28  ;;  %v937_v35 = vld [vmem:[%s2146_s8 + $0x18] sm:$0xff]  ;;  %v1749_v38 = vmov 0   ;;  %v1453_v39 = vcombine.low %v936_v32, %v940_v34 }
  0xfb   :  { %v1455_v40 = vcombine.low %v937_v35, %v941_v37 }
  0xfc   :  { %v688_v43 = vadd.f32 %v1509_v36, %v648_v42  ;;  %v1454_v36 = vcombine.high %v936_v32, %v940_v34  ;;  %v1456_v42 = vcombine.high %v937_v35, %v941_v37 }
 0x116   :  { %v1529_v44 = vpop.f32.mrb[4].mxu0 }
 0x117   :  { %v1551_v45 = vpop.f32.mrb[4].mxu1  ;;  %v1530_v46 = vpop.f32.mrb[5].mxu0 }
 0x118   :  { %v1552_v47 = vpop.f32.mrb[5].mxu1  ;;  %v1531_v48 = vadd.f32 %v1530_v46, %v1529_v44  ;;  %v1532_v50 = vpop.f32.mrb[6].mxu0  ;;  %v944_v44 = vld [vmem:[%s2146_s8 + $0x50] sm:$0xff] }
 0x119   :  { %v1553_v49 = vadd.f32 %v1552_v47, %v1551_v45  ;;  %v1554_v51 = vpop.f32.mrb[6].mxu1  ;;  %v1533_v52 = vpop.f32.mrb[7].mxu0  ;;  %v948_v46 = vld [vmem:[%s2146_s8 + $0x70] sm:$0xff]  ;;  %v945_v47 = vld [vmem:[%s2146_s8 + $0x58] sm:$0xff] }
 0x11a   :  { %v1555_v53 = vpop.f32.mrb[7].mxu1  ;;  %v728_v54 = vadd.f32 %v1531_v48, %v688_v43  ;;  %v1444_v43 = vld [vmem:[%s2145_s7] ss:$0 sm:$0xff]  ;;  %v949_v48 = vld [vmem:[%s2146_s8 + $0x78] sm:$0xff]  ;;  %s1750_s7 = smov 32   ;;  %s1751_s8 = smov [#allocation2]  }
 0x11b   :  { %s1352_s4 = sshll.u32 %s1751_s8, 4  ;;  %s1353_s4 = int_to_ptr.vmem [resolvable:$true] %s1352_s4 }
 0x11c   :  { %v768_v55 = vadd.f32 %v1553_v49, %v728_v54  ;;  %s1698_s13 = scalar_lea.vmem %s1353_s4, 32  ;;  %p1703_p1 = scmp.lt.s32.totalorder %s1353_s4, %s1353_s4 }
 0x11d   :  { %p1699_p0 = scmp.ne.s32.totalorder %s1353_s4, %s1698_s13  ;;  %p1704_p2 = scmp.lt.s32.totalorder %s1698_s13, %s1698_s13 }
 0x11e   :  { %v773_v56 = vsub.f32 0.0, %v768_v55 }
 0x11f   :  { %p1705_p3 = por %p1704_p2, %p1703_p1 }
 0x120   :  { %v774_v57 = vmul.f32 1.442695, %v773_v56  ;;  %v1464_v56 = vcombine.high %v945_v47, %v949_v48 }
 0x121   :  { %p1706_p4 = pnand %p1705_p3, %p1699_p0 }
 0x122   :  { %1656 = vpow2.f32 %v774_v57 }
 0x12c   :  { %v1657_v58 = vpop.eup %1656 }
 0x12d   :  { %v776_v59 = vadd.f32 1.0, %v1657_v58  ;;  %v1461_v58 = vcombine.low %v944_v44, %v948_v46 }
 0x12f   :  { %1658 = vrcp.f32 %v776_v59  ;;  %v1463_v59 = vcombine.low %v945_v47, %v949_v48 }
 0x139   :  { %v1659_v60 = vpop.eup %1658 }
 0x13a   :  { %v778_v61 = vmul.f32 %v1659_v60, %v768_v55  ;;  %v1462_v55 = vcombine.high %v944_v44, %v948_v46 }
 0x13c   :  { %v779_v62 = vpack.c.bf16 %v778_v61, %v778_v61 }
 0x13e   :  { %1568 = vmatmul.mubr.msk.bf16.vlgmr.msra.gmra.mrb[8].mxu0 %vm803_vm1, %v779_v62 }
 0x13f   :  { %1076 = vmatpush1.bf16.msra.mxu0 %v1449_v4  ;;  %1107 = vmatprep.mubr.bf16.mxu0 %v1749_v38 }
 0x140   :  { %1077 = vmatprep.subr.bf16.mxu0 %v1458_v27 }
 0x143   :  { %1078 = vmatpush1.bf16.msra.mxu0 %v1457_v29 }
 0x144   :  { %1157 = vmatprep.subr.bf16.mxu0 %v1454_v36 }
 0x211   :  { %v841_v10 = vpop.f32.mrb[8].mxu0 }
 0x212   :  { %v842_v11 = vadd.f32 %v1439_v9, %v841_v10  ;;  %v1569_v12 = vpop.f32.mrb[9].mxu0 }
 0x213   :  { %v844_v13 = vpop.f32.mrb[10].mxu0 }
 0x214   :  { %v847_v14 = vsub.f32 0.0, %v842_v11  ;;  %v1570_v15 = vpop.f32.mrb[11].mxu0 }
 0x216   :  { %v848_v16 = vmul.f32 1.442695, %v847_v14 }
 0x218   :  { %1660 = vpow2.f32 %v848_v16 }
 0x222   :  { %v1661_v17 = vpop.eup %1660 }
 0x223   :  { %v850_v18 = vadd.f32 1.0, %v1661_v17 }
 0x225   :  { %1662 = vrcp.f32 %v850_v18 }
 0x22f   :  { %v1663_v19 = vpop.eup %1662 }
 0x230   :  { %v852_v21 = vmul.f32 %v1663_v19, %v842_v11 }
 0x232   :  { %v860_v22 = vadd.f32 %v1443_v20, %v852_v21 }
 0x234   :  { %v861_v23 = vpack.c.bf16 %v860_v22, %v860_v22 }
 0x236   :  { %1576 = vmatmul.mubr.msk.bf16.vlgmr.msra.gmra.mrb[8].mxu1 %vm803_vm1, %v861_v23 }
 0x237   :  { %1117 = vmatpush1.bf16.msra.mxu1 %v1451_v7  ;;  %1148 = vmatprep.mubr.bf16.mxu1 %v1749_v38 }
 0x238   :  { %1118 = vmatprep.subr.bf16.mxu1 %v1460_v31 }
 0x23b   :  { %1119 = vmatpush1.bf16.msra.mxu1 %v1459_v30 }
 0x23c   :  { %1198 = vmatprep.subr.bf16.mxu1 %v1456_v42 }
 0x309   :  { %v922_v45 = vpop.f32.mrb[8].mxu1 }
 0x30a   :  { %v923_v49 = vadd.f32 %v1444_v43, %v922_v45  ;;  %v1577_v50 = vpop.f32.mrb[9].mxu1 }
 0x30b   :  { %v925_v51 = vpop.f32.mrb[10].mxu1 }
 0x30c   :  { %v1448_v52 = vclamps-f32 %v923_v49, 10.0  ;;  %v933_v53 = vpack.c.bf16 %v923_v49, %v923_v49  ;;  %1334 = vrot.lane.b32.xlu0 %v923_v49, %s1750_s7  ;;  %v1578_v54 = vpop.f32.mrb[11].mxu1 }
 0x30e   :  { %v930_v57 = vmul.f32 0.5, %v1448_v52  ;;  %1465 = vmatmul.mubr.msk.bf16.vlgmr.msra.gmra.mrb[12].mxu0 %vm803_vm1, %v933_v53  ;;  %1466 = vmatmul.mubr.msk.bf16.vlgmr.msra.gmra.mrb[12].mxu1 %vm803_vm1, %v933_v53 }
 0x30f   :  { %1158 = vmatpush1.bf16.msra.mxu0 %v1453_v39  ;;  %1199 = vmatpush1.bf16.msra.mxu1 %v1455_v40 }
 0x310   :  { %v931_v60 = vmul.f32 1.442695, %v930_v57  ;;  %1159 = vmatprep.subr.bf16.mxu0 %v1462_v55  ;;  %1200 = vmatprep.subr.bf16.mxu1 %v1464_v56 }
 0x311   :  { %1189 = vmatprep.mubr.bf16.mxu0 %v1749_v38  ;;  %1230 = vmatprep.mubr.bf16.mxu1 %v1749_v38 }
 0x312   :  { %1664 = vpow2.f32 %v931_v60 }
 0x313   :  { %1160 = vmatpush1.bf16.msra.mxu0 %v1461_v58  ;;  %1201 = vmatpush1.bf16.msra.mxu1 %v1463_v59 }
 0x316   :  { %1467 = vmatmul.mubr.msk.bf16.vlgmr.msra.gmra.mrb[16].mxu0 %vm803_vm1, %v933_v53  ;;  %1468 = vmatmul.mubr.msk.bf16.vlgmr.msra.gmra.mrb[16].mxu1 %vm803_vm1, %v933_v53 }
 0x31c   :  { %v1665_v61 = vpop.eup %1664 }
 0x31d   :  { %1338 = vrot.lane.b32.xlu0 %v1665_v61, %s1750_s7 }
 0x37e   :  { %v1335_v62 = vpop.permute.xlu0 %1334 }
 0x37f   :  { %v1341_v63 = vsel %vm803_vm1, %v923_v49, %v1335_v62 }
 0x38f   :  { %v1339_v0 = vpop.permute.xlu0 %1338 }
 0x390   :  { %v1343_v1 = vsel %vm1342_vm2, %v1341_v63, %v1339_v0 }
 0x391   :  { %1345 = vst.msk [vmem:[#allocation2] sm:$0x3] %vm1344_vm3, %v1343_v1 }
 0x392   :  { %1709 = shalt.err (!%p1706_p4)
}
 0x393   :  { %s1710_s16 = scalar_lea.hbm %s2148_s10, 32 }
 0x394   :  { %p1711_p5 = scmp.ne.s32.totalorder %s2148_s10, %s1710_s16  ;;  %p1714_p6 = scmp.lt.u32.totalorder %s1710_s16, %s2148_s10 }
 0x396   :  { %p1716_p7 = pnand %p1714_p6, %p1711_p5 }
 0x398   :  { %1719 = shalt.err (!%p1716_p7)
}
 0x399   :  { %1355 = dma.vmem_to_hbm [thread:$0]  %s1353_s4, 32, %s2148_s10, [#allocation3]   ;;  %v954_v2 = vsub.s32 0, %v1909_v33  ;;  %v962_v3 = vsub.s32 2, %v1909_v33  ;;  %v950_v4 = vld [vmem:[%s2147_s9] sm:$0xff]  ;;  %v958_v5 = vsub.s32 1, %v1909_v33 }
 0x39a   :  { %v966_v6 = vsub.s32 3, %v1909_v33  ;;  %v970_v17 = vsub.s32 4, %v1909_v33  ;;  %v978_v18 = vsub.s32 6, %v1909_v33  ;;  %v974_v23 = vsub.s32 5, %v1909_v33  ;;  %s1752_s9 = smov [#allocation4]  }
 0x39b   :  { %v955_v7 = vrot.slane %v950_v4, %v954_v2  ;;  %v963_v8 = vrot.slane %v950_v4, %v962_v3  ;;  %v959_v9 = vrot.slane %v950_v4, %v958_v5  ;;  %v982_v24 = vsub.s32 7, %v1909_v33  ;;  %s1362_s10 = sshll.u32 %s1752_s9, 4  ;;  %s1363_s10 = int_to_ptr.vmem [resolvable:$true] %s1362_s10 }
 0x39c   :  { %v967_v10 = vrot.slane %v950_v4, %v966_v6  ;;  %v971_v34 = vrot.slane %v950_v4, %v970_v17  ;;  %v979_v35 = vrot.slane %v950_v4, %v978_v18  ;;  %v975_v38 = vrot.slane %v950_v4, %v974_v23  ;;  %s1720_s21 = scalar_lea.vmem %s1363_s10, 256  ;;  %p1725_p9 = scmp.lt.s32.totalorder %s1363_s10, %s1363_s10 }
 0x39d   :  { %v983_v39 = vrot.slane %v950_v4, %v982_v24  ;;  %p1721_p8 = scmp.ne.s32.totalorder %s1363_s10, %s1720_s21  ;;  %p1726_p10 = scmp.lt.s32.totalorder %s1720_s21, %s1720_s21 }
 0x39f   :  { %p1727_p11 = por %p1726_p10, %p1725_p9 }
 0x3a1   :  { %p1728_p12 = pnand %p1727_p11, %p1721_p8 }
 0x3e1   :  { %v1109_v11 = vpop.f32.mrb[12].mxu0  ;;  %v1150_v12 = vpop.f32.mrb[12].mxu1 }
 0x3e2   :  { %v1110_v13 = vadd.f32 %v1109_v11, %v955_v7  ;;  %v1151_v14 = vadd.f32 %v1150_v12, %v963_v8  ;;  %v1111_v15 = vpop.f32.mrb[13].mxu0  ;;  %v1152_v16 = vpop.f32.mrb[13].mxu1 }
 0x3e3   :  { %v1112_v19 = vadd.f32 %v1111_v15, %v959_v9  ;;  %v1153_v20 = vadd.f32 %v1152_v16, %v967_v10  ;;  %v1113_v21 = vpop.f32.mrb[14].mxu0  ;;  %v1154_v22 = vpop.f32.mrb[14].mxu1 }
 0x3e4   :  { %v1239_v25 = vsub.f32 0.0, %v1110_v13  ;;  %v1241_v26 = vsub.f32 0.0, %v1151_v14  ;;  %v1114_v27 = vpop.f32.mrb[15].mxu0  ;;  %v1155_v28 = vpop.f32.mrb[15].mxu1 }
 0x3e5   :  { %v1240_v29 = vsub.f32 0.0, %v1112_v19  ;;  %v1242_v30 = vsub.f32 0.0, %v1153_v20 }
 0x3e6   :  { %v1247_v31 = vmul.f32 1.442695, %v1239_v25  ;;  %v1251_v32 = vmul.f32 1.442695, %v1241_v26 }
 0x3e7   :  { %v1249_v36 = vmul.f32 1.442695, %v1240_v29  ;;  %v1253_v37 = vmul.f32 1.442695, %v1242_v30 }
 0x3e8   :  { %1666 = vpow2.f32 %v1247_v31 }
 0x3e9   :  { %1668 = vpow2.f32 %v1251_v32  ;;  %v1191_v40 = vpop.f32.mrb[16].mxu0  ;;  %v1232_v42 = vpop.f32.mrb[16].mxu1 }
 0x3ea   :  { %1670 = vpow2.f32 %v1249_v36  ;;  %v1192_v33 = vadd.f32 %v1191_v40, %v971_v34  ;;  %v1233_v43 = vadd.f32 %v1232_v42, %v979_v35  ;;  %v1193_v44 = vpop.f32.mrb[17].mxu0  ;;  %v1234_v45 = vpop.f32.mrb[17].mxu1 }
 0x3eb   :  { %1672 = vpow2.f32 %v1253_v37  ;;  %v1194_v46 = vadd.f32 %v1193_v44, %v975_v38  ;;  %v1235_v47 = vadd.f32 %v1234_v45, %v983_v39  ;;  %v1195_v48 = vpop.f32.mrb[18].mxu0  ;;  %v1236_v49 = vpop.f32.mrb[18].mxu1 }
 0x3ec   :  { %v1243_v50 = vsub.f32 0.0, %v1192_v33  ;;  %v1245_v51 = vsub.f32 0.0, %v1233_v43  ;;  %v1196_v52 = vpop.f32.mrb[19].mxu0  ;;  %v1237_v53 = vpop.f32.mrb[19].mxu1 }
 0x3ed   :  { %v1244_v54 = vsub.f32 0.0, %v1194_v46  ;;  %v1246_v55 = vsub.f32 0.0, %v1235_v47 }
 0x3ee   :  { %v1255_v56 = vmul.f32 1.442695, %v1243_v50  ;;  %v1259_v57 = vmul.f32 1.442695, %v1245_v51 }
 0x3ef   :  { %v1257_v58 = vmul.f32 1.442695, %v1244_v54  ;;  %v1261_v59 = vmul.f32 1.442695, %v1246_v55 }
 0x3f0   :  { %1674 = vpow2.f32 %v1255_v56 }
 0x3f1   :  { %1676 = vpow2.f32 %v1259_v57 }
 0x3f2   :  { %v1667_v60 = vpop.eup %1666  ;;  %1678 = vpow2.f32 %v1257_v58 }
 0x3f3   :  { %v1669_v61 = vpop.eup %1668  ;;  %v1263_v62 = vadd.f32 1.0, %v1667_v60  ;;  %1680 = vpow2.f32 %v1261_v59 }
 0x3f4   :  { %v1671_v63 = vpop.eup %1670  ;;  %v1265_v0 = vadd.f32 1.0, %v1669_v61 }
 0x3f5   :  { %v1673_v1 = vpop.eup %1672  ;;  %1682 = vrcp.f32 %v1263_v62  ;;  %v1264_v2 = vadd.f32 1.0, %v1671_v63 }
 0x3f6   :  { %1684 = vrcp.f32 %v1265_v0  ;;  %v1266_v3 = vadd.f32 1.0, %v1673_v1 }
 0x3f7   :  { %1686 = vrcp.f32 %v1264_v2 }
 0x3f8   :  { %1688 = vrcp.f32 %v1266_v3 }
 0x3fa   :  { %v1675_v4 = vpop.eup %1674 }
 0x3fb   :  { %v1677_v5 = vpop.eup %1676  ;;  %v1267_v6 = vadd.f32 1.0, %v1675_v4 }
 0x3fc   :  { %v1679_v7 = vpop.eup %1678  ;;  %v1269_v8 = vadd.f32 1.0, %v1677_v5 }
 0x3fd   :  { %v1681_v9 = vpop.eup %1680  ;;  %1690 = vrcp.f32 %v1267_v6  ;;  %v1268_v10 = vadd.f32 1.0, %v1679_v7 }
 0x3fe   :  { %1692 = vrcp.f32 %v1269_v8  ;;  %v1270_v11 = vadd.f32 1.0, %v1681_v9 }
 0x3ff   :  { %v1683_v12 = vpop.eup %1682  ;;  %1694 = vrcp.f32 %v1268_v10 }
 0x400   :  { %v1685_v13 = vpop.eup %1684  ;;  %1696 = vrcp.f32 %v1270_v11 }
 0x401   :  { %v1687_v14 = vpop.eup %1686 }
 0x402   :  { %v1689_v15 = vpop.eup %1688  ;;  %v1295_v16 = vcombine.low %v1683_v12, %v1687_v14 }
 0x403   :  { %v1296_v17 = vcombine.low %v1685_v13, %v1689_v15 }
 0x404   :  { %v1303_v18 = vrot.slane %v1295_v16, %v1921_v41 }
 0x405   :  { %v1310_v19 = vrot.slane %v1296_v17, %v1921_v41 }
 0x407   :  { %v1691_v20 = vpop.eup %1690  ;;  %v1311_v21 = vcombine.low %v1303_v18, %v1310_v19 }
 0x408   :  { %v1693_v22 = vpop.eup %1692 }
 0x409   :  { %v1695_v23 = vpop.eup %1694  ;;  %1331 = vst [vmem:[#allocation4] sm:$0xff] %v1311_v21 }
 0x40a   :  { %v1697_v24 = vpop.eup %1696  ;;  %v1312_v25 = vcombine.low %v1691_v20, %v1695_v23 }
 0x40b   :  { %v1313_v26 = vcombine.low %v1693_v22, %v1697_v24 }
 0x40c   :  { %v1320_v27 = vrot.slane %v1312_v25, %v1921_v41 }
 0x40d   :  { %v1327_v28 = vrot.slane %v1313_v26, %v1921_v41 }
 0x40f   :  { %v1328_v29 = vcombine.low %v1320_v27, %v1327_v28 }
 0x411   :  { %1332 = vst [vmem:[#allocation4 + $0x8] sm:$0xff] %v1328_v29 }
 0x412   :  { %1731 = shalt.err (!%p1728_p12)
}
 0x413   :  { %s1732_s24 = scalar_lea.hbm %s2149_s11, 256 }
 0x414   :  { %p1733_p13 = scmp.ne.s32.totalorder %s2149_s11, %s1732_s24  ;;  %p1736_p0 = scmp.lt.u32.totalorder %s1732_s24, %s2149_s11 }
 0x416   :  { %p1738_p1 = pnand %p1736_p0, %p1733_p13 }
 0x418   :  { %1741 = shalt.err (!%p1738_p1)
}
 0x419   :  { %1365 = dma.vmem_to_hbm [thread:$0]  %s1363_s10, 256, %s2149_s11, [#allocation5]  }
 0x41a   :  { %1742 = dma.done.wait [#allocation3], 32  }
 0x41b   :  { %1743 = vsyncadd [#allocation3], 4294967264 }
 0x41c   :  { %1744 = dma.done.wait [#allocation5], 256  }
 0x41d   :  { %1745 = vsyncadd [#allocation5], 4294967040 }
 0x41e   :  { %1372 = vsyncpa [#allocation3], 1 }
 0x41f   :  { %1373 = vsyncpa [#allocation5], 1 }

</bundles_post_ra>
